<compile_context>
chip_gen: v5e
topology: v5e:2x2
jax: 0.10.0
libtpu: 0.0.40
codegen_flags: <defaults>
</compile_context>

<pallas_src>
import functools

import jax
import jax.numpy as jnp
from jax.experimental import pallas as pl
from jax.experimental.pallas import tpu as pltpu


def _round_up(x, m):
    return (x + m - 1) // m * m


def _cosformer_output_kernel(h_ref, res_ref, w_ref, b_ref, g_ref, beta_ref,
                             o_ref, *, eps):
    # h_ref:    (TM, K)  tile of the intermediate activations (maybe bf16)
    # res_ref:  (TM, H)  tile of the residual (input_tensor)
    # w_ref:    (K, H)   full dense weight, pre-transposed (grid-invariant)
    # b_ref:    (1, H)   dense bias                         (grid-invariant)
    # g_ref:    (1, H)   LayerNorm gamma                    (grid-invariant)
    # beta_ref: (1, H)   LayerNorm beta                     (grid-invariant)
    # o_ref:    (TM, H)  output tile
    bias = b_ref[...].astype(jnp.float32)
    gamma = g_ref[...].astype(jnp.float32)
    beta = beta_ref[...].astype(jnp.float32)

    # MXU matmul with f32 accumulation (inputs may be bf16).
    x = jnp.dot(h_ref[...], w_ref[...], preferred_element_type=jnp.float32)
    # TODO(synk): dropout is a no-op in eval mode; training-mode dropout could
    # be added here with pltpu.prng_seed / pltpu.prng_random_bits.
    x = x + bias + res_ref[...].astype(jnp.float32)

    # LayerNorm math stays in f32 (two-pass mean/var for numerical stability).
    mean = jnp.mean(x, axis=-1, keepdims=True)
    centered = x - mean
    var = jnp.mean(centered * centered, axis=-1, keepdims=True)
    inv = jax.lax.rsqrt(var + eps)
    o_ref[...] = (centered * inv * gamma + beta).astype(o_ref.dtype)


def cosformer_output(hidden_states, input_tensor, weight_t, bias, gamma, beta,
                     *, eps=1e-12, row_tile=512, matmul_dtype=None,
                     vmem_limit_bytes=None, single_buffer_invariants=True):
    """Fused dense + residual-add + LayerNorm.

    hidden_states: (B, S, K)  intermediate activations
    input_tensor:  (B, S, H)  residual
    weight_t:      (K, H)     dense weight, pre-transposed (= torch weight.T)
    bias, gamma, beta: (H,)
    matmul_dtype:  optional dtype (e.g. jnp.bfloat16) for the matmul operands;
                   accumulation and LayerNorm stay in f32.
    """
    B, S, K = hidden_states.shape
    H = input_tensor.shape[-1]
    rows = B * S
    out_dtype = hidden_states.dtype  # record before any matmul-dtype cast

    if matmul_dtype is not None:
        hidden_states = hidden_states.astype(matmul_dtype)
        weight_t = weight_t.astype(matmul_dtype)

    # Row-tile sizing: 16-row alignment covers both f32 (8) and packed 16-bit
    # (16) sublane layouts; clamp to the padded row count so tiny inputs work.
    ROW_ALIGN = 16
    row_tile = max(ROW_ALIGN, min(int(row_tile), _round_up(rows, ROW_ALIGN)))
    row_tile = _round_up(row_tile, ROW_ALIGN)
    padded_rows = _round_up(rows, row_tile)
    grid = (padded_rows // row_tile,)
    # NOTE: at production sizes keep row_tile small enough that the grid has at
    # least a few dozen steps so the "parallel" axis shards across v7x's 2 TCs.

    h2 = hidden_states.reshape(rows, K)
    r2 = input_tensor.reshape(rows, H)
    if padded_rows != rows:
        pad = padded_rows - rows
        h2 = jnp.pad(h2, ((0, pad), (0, 0)))
        r2 = jnp.pad(r2, ((0, pad), (0, 0)))
    b2 = bias.reshape(1, H)
    g2 = gamma.reshape(1, H)
    be2 = beta.reshape(1, H)
    # TODO(synk): when H < 128, repack the (rows, H) output (and residual) into
    # a lane-dense (rows*H/128, 128) slab in the wrapper to avoid masked
    # partial stores; moot when H is a multiple of 128 (e.g. 768).

    if vmem_limit_bytes is None:
        # Double-buffered streaming tiles + (conservatively double-buffered)
        # grid-invariant operands, plus headroom for compiler scratch.
        est = (2 * row_tile * K * h2.dtype.itemsize            # hidden tiles
               + 2 * row_tile * H * r2.dtype.itemsize          # residual tiles
               + 2 * row_tile * H * jnp.dtype(out_dtype).itemsize  # out tiles
               + 2 * K * H * weight_t.dtype.itemsize           # weight
               + 2 * 3 * H * 4)                                # bias/gamma/beta
        vmem_limit_bytes = min(96 * 1024 * 1024,
                               max(16 * 1024 * 1024, 2 * est))

    kernel = functools.partial(_cosformer_output_kernel, eps=eps)
    out_shape = jax.ShapeDtypeStruct((padded_rows, H), out_dtype)
    compiler_params = pltpu.CompilerParams(
        dimension_semantics=("parallel",),
        vmem_limit_bytes=int(vmem_limit_bytes))

    def run(single_buffer):
        def const_spec(shape):
            if single_buffer:
                # Grid-invariant operand: one VMEM copy is enough (no benefit
                # from double buffering a block whose index never changes).
                return pl.BlockSpec(shape, lambda i: (0, 0),
                                    pipeline_mode=pl.Buffered(1))
            return pl.BlockSpec(shape, lambda i: (0, 0))

        return pl.pallas_call(
            kernel,
            out_shape=out_shape,
            grid=grid,
            in_specs=[
                pl.BlockSpec((row_tile, K), lambda i: (i, 0)),  # hidden tile
                pl.BlockSpec((row_tile, H), lambda i: (i, 0)),  # residual tile
                const_spec((K, H)),                             # weight
                const_spec((1, H)),                             # bias
                const_spec((1, H)),                             # gamma
                const_spec((1, H)),                             # beta
            ],
            out_specs=pl.BlockSpec((row_tile, H), lambda i: (i, 0)),
            compiler_params=compiler_params,
        )(h2, r2, weight_t, b2, g2, be2)

    if single_buffer_invariants:
        try:
            out = run(True)
        except Exception:  # compatibility fallback: JAX w/o pipeline_mode
            out = run(False)
    else:
        out = run(False)

    if padded_rows != rows:
        out = out[:rows]
    return out.reshape(B, S, H)


def _reference(hidden_states, input_tensor, weight_t, bias, gamma, beta, eps):
    x = jnp.einsum("bsk,kh->bsh", hidden_states.astype(jnp.float32),
                   weight_t.astype(jnp.float32),
                   precision=jax.lax.Precision.HIGHEST) + bias
    x = x + input_tensor.astype(jnp.float32)
    mean = jnp.mean(x, axis=-1, keepdims=True)
    var = jnp.mean((x - mean) ** 2, axis=-1, keepdims=True)
    return (x - mean) * jax.lax.rsqrt(var + eps) * gamma + beta


if __name__ == "__main__":
    EPS = 1e-12
    key = jax.random.PRNGKey(0)

    def make_inputs(k, B, S, H, K):
        k1, k2, k3, k4, k5, k6 = jax.random.split(k, 6)
        hidden_states = jax.random.normal(k1, (B, S, K), dtype=jnp.float32)
        input_tensor = jax.random.normal(k2, (B, S, H), dtype=jnp.float32)
        # nn.Linear(intermediate_size, hidden_size): weight (H,K) -> store (K,H).
        weight_t = (jax.random.normal(k3, (K, H), dtype=jnp.float32)
                    / jnp.sqrt(K))
        bias = jax.random.normal(k4, (H,), dtype=jnp.float32) * 0.02
        gamma = 1.0 + 0.1 * jax.random.normal(k5, (H,), dtype=jnp.float32)
        beta = 0.05 * jax.random.normal(k6, (H,), dtype=jnp.float32)
        return hidden_states, input_tensor, weight_t, bias, gamma, beta

    k_a, k_b = jax.random.split(key)

    # 1) Lane-aligned hidden size (H % 128 == 0), f32 matmul path.
    args = make_inputs(k_a, B=2, S=8, H=128, K=512)
    out = jax.block_until_ready(cosformer_output(*args, eps=EPS))
    ref = _reference(*args, EPS)
    assert out.shape == (2, 8, 128)
    assert jnp.allclose(out, ref, atol=1e-3, rtol=1e-3), "f32 mismatch"

    # 2) Same shapes, bf16 matmul inputs (native MXU path), f32 LayerNorm math.
    out_bf16 = jax.block_until_ready(
        cosformer_output(*args, eps=EPS, matmul_dtype=jnp.bfloat16))
    assert out_bf16.dtype == jnp.float32
    assert jnp.allclose(out_bf16, ref, atol=5e-2, rtol=5e-2), "bf16 mismatch"

    # 3) Ragged row count (B*S not a multiple of the tile) and small H (<128),
    #    exercising the padding path and masked-store correctness.
    args_small = make_inputs(k_b, B=3, S=7, H=32, K=64)
    out_small = jax.block_until_ready(cosformer_output(*args_small, eps=EPS))
    ref_small = _reference(*args_small, EPS)
    assert out_small.shape == (3, 7, 32)
    assert jnp.allclose(out_small, ref_small, atol=1e-3, rtol=1e-3), \
        "ragged/small-H mismatch"

    print("KERNEL_OK")
</pallas_src>

<mosaic_0001>
module attributes {stable_mosaic.version = 11 : i64} {
  func.func @_cosformer_output_kernel(%arg0: i32, %arg1: memref<16x512xf32, #tpu.memory_space<vmem>>, %arg2: memref<16x128xf32, #tpu.memory_space<vmem>>, %arg3: memref<512x128xf32, #tpu.memory_space<vmem>>, %arg4: memref<1x128xf32, #tpu.memory_space<vmem>>, %arg5: memref<1x128xf32, #tpu.memory_space<vmem>>, %arg6: memref<1x128xf32, #tpu.memory_space<vmem>>, %arg7: memref<16x128xf32, #tpu.memory_space<vmem>>) attributes {dimension_semantics = [#tpu.dimension_semantics<parallel>], iteration_bounds = array<i64: 1>, scalar_prefetch = 0 : i64, scratch_operands = 0 : i64, tpu.core_type = #tpu.core_type<tc>, window_params = [{transform_indices = @transform_0, window_bounds = array<i64: 16, 512>}, {transform_indices = @transform_1, window_bounds = array<i64: 16, 128>}, {pipeline_mode = #tpu.pipeline_mode<synchronous>, transform_indices = @transform_2, window_bounds = array<i64: 512, 128>}, {pipeline_mode = #tpu.pipeline_mode<synchronous>, transform_indices = @transform_3, window_bounds = array<i64: 1, 128>}, {pipeline_mode = #tpu.pipeline_mode<synchronous>, transform_indices = @transform_4, window_bounds = array<i64: 1, 128>}, {pipeline_mode = #tpu.pipeline_mode<synchronous>, transform_indices = @transform_5, window_bounds = array<i64: 1, 128>}, {transform_indices = @transform_6, window_bounds = array<i64: 16, 128>}]} {
    %c0 = arith.constant 0 : index
    %c0_0 = arith.constant 0 : index
    %0 = vector.load %arg4[%c0, %c0_0] : memref<1x128xf32, #tpu.memory_space<vmem>>, vector<1x128xf32>
    %c0_1 = arith.constant 0 : index
    %c0_2 = arith.constant 0 : index
    %1 = vector.load %arg5[%c0_1, %c0_2] : memref<1x128xf32, #tpu.memory_space<vmem>>, vector<1x128xf32>
    %c0_3 = arith.constant 0 : index
    %c0_4 = arith.constant 0 : index
    %2 = vector.load %arg6[%c0_3, %c0_4] : memref<1x128xf32, #tpu.memory_space<vmem>>, vector<1x128xf32>
    %c0_5 = arith.constant 0 : index
    %c0_6 = arith.constant 0 : index
    %3 = vector.load %arg1[%c0_5, %c0_6] : memref<16x512xf32, #tpu.memory_space<vmem>>, vector<16x512xf32>
    %c0_7 = arith.constant 0 : index
    %c0_8 = arith.constant 0 : index
    %4 = vector.load %arg3[%c0_7, %c0_8] : memref<512x128xf32, #tpu.memory_space<vmem>>, vector<512x128xf32>
    %cst = arith.constant dense<0.000000e+00> : vector<16x128xf32>
    %5 = tpu.matmul %3, %4, %cst {dimension_numbers = #tpu.dot_dimension_numbers<[1], [0], [0], [1], [0, 0, 1, 1], [], []>} : vector<16x512xf32>, vector<512x128xf32>, vector<16x128xf32> -> vector<16x128xf32>
    %6 = vector.broadcast %0 : vector<1x128xf32> to vector<16x128xf32>
    %7 = arith.addf %5, %6 : vector<16x128xf32>
    %c0_9 = arith.constant 0 : index
    %c0_10 = arith.constant 0 : index
    %8 = vector.load %arg2[%c0_9, %c0_10] : memref<16x128xf32, #tpu.memory_space<vmem>>, vector<16x128xf32>
    %9 = arith.addf %7, %8 : vector<16x128xf32>
    %cst_11 = arith.constant dense<0.000000e+00> : vector<16xf32>
    %10 = vector.multi_reduction <add>, %9, %cst_11 [1] : vector<16x128xf32> to vector<16xf32>
    %11 = vector.shape_cast %10 : vector<16xf32> to vector<16x1xf32>
    %cst_12 = arith.constant 1.280000e+02 : f32
    %12 = vector.broadcast %cst_12 : f32 to vector<16x1xf32>
    %13 = arith.divf %11, %12 : vector<16x1xf32>
    %14 = vector.broadcast %13 : vector<16x1xf32> to vector<16x128xf32>
    %15 = arith.subf %9, %14 : vector<16x128xf32>
    %16 = arith.mulf %15, %15 : vector<16x128xf32>
    %cst_13 = arith.constant dense<0.000000e+00> : vector<16xf32>
    %17 = vector.multi_reduction <add>, %16, %cst_13 [1] : vector<16x128xf32> to vector<16xf32>
    %18 = vector.shape_cast %17 : vector<16xf32> to vector<16x1xf32>
    %cst_14 = arith.constant 1.280000e+02 : f32
    %19 = vector.broadcast %cst_14 : f32 to vector<16x1xf32>
    %20 = arith.divf %18, %19 : vector<16x1xf32>
    %cst_15 = arith.constant 9.99999996E-13 : f32
    %21 = vector.broadcast %cst_15 : f32 to vector<16x1xf32>
    %22 = arith.addf %20, %21 : vector<16x1xf32>
    %23 = math.rsqrt %22 : vector<16x1xf32>
    %24 = vector.broadcast %23 : vector<16x1xf32> to vector<16x128xf32>
    %25 = arith.mulf %15, %24 : vector<16x128xf32>
    %26 = vector.broadcast %1 : vector<1x128xf32> to vector<16x128xf32>
    %27 = arith.mulf %25, %26 : vector<16x128xf32>
    %28 = vector.broadcast %2 : vector<1x128xf32> to vector<16x128xf32>
    %29 = arith.addf %27, %28 : vector<16x128xf32>
    %c0_16 = arith.constant 0 : index
    %c0_17 = arith.constant 0 : index
    %30 = vector.load %arg7[%c0_16, %c0_17] : memref<16x128xf32, #tpu.memory_space<vmem>>, vector<16x128xf32>
    tpu.vector_store %arg7[%c0_16, %c0_17], %29 {strides = array<i32>} : memref<16x128xf32, #tpu.memory_space<vmem>>, vector<16x128xf32>,
    return
  }
  func.func @transform_0(%arg0: i32) -> (i32, i32) {
    %c0_i32 = arith.constant 0 : i32
    %c0_i32_0 = arith.constant 0 : i32
    return %arg0, %c0_i32 : i32, i32
  }
  func.func @transform_1(%arg0: i32) -> (i32, i32) {
    %c0_i32 = arith.constant 0 : i32
    %c0_i32_0 = arith.constant 0 : i32
    return %arg0, %c0_i32 : i32, i32
  }
  func.func @transform_2(%arg0: i32) -> (i32, i32) {
    %c0_i32 = arith.constant 0 : i32
    %c0_i32_0 = arith.constant 0 : i32
    %c0_i32_1 = arith.constant 0 : i32
    return %c0_i32, %c0_i32_0 : i32, i32
  }
  func.func @transform_3(%arg0: i32) -> (i32, i32) {
    %c0_i32 = arith.constant 0 : i32
    %c0_i32_0 = arith.constant 0 : i32
    %c0_i32_1 = arith.constant 0 : i32
    return %c0_i32, %c0_i32_0 : i32, i32
  }
  func.func @transform_4(%arg0: i32) -> (i32, i32) {
    %c0_i32 = arith.constant 0 : i32
    %c0_i32_0 = arith.constant 0 : i32
    %c0_i32_1 = arith.constant 0 : i32
    return %c0_i32, %c0_i32_0 : i32, i32
  }
  func.func @transform_5(%arg0: i32) -> (i32, i32) {
    %c0_i32 = arith.constant 0 : i32
    %c0_i32_0 = arith.constant 0 : i32
    %c0_i32_1 = arith.constant 0 : i32
    return %c0_i32, %c0_i32_0 : i32, i32
  }
  func.func @transform_6(%arg0: i32) -> (i32, i32) {
    %c0_i32 = arith.constant 0 : i32
    %c0_i32_0 = arith.constant 0 : i32
    return %arg0, %c0_i32 : i32, i32
  }
}

module attributes {stable_mosaic.version = 11 : i64} {
  func.func @_cosformer_output_kernel(%arg0: i32, %arg1: memref<16x512xf32, #tpu.memory_space<vmem>>, %arg2: memref<16x128xf32, #tpu.memory_space<vmem>>, %arg3: memref<512x128xf32, #tpu.memory_space<vmem>>, %arg4: memref<1x128xf32, #tpu.memory_space<vmem>>, %arg5: memref<1x128xf32, #tpu.memory_space<vmem>>, %arg6: memref<1x128xf32, #tpu.memory_space<vmem>>, %arg7: memref<16x128xf32, #tpu.memory_space<vmem>>) attributes {dimension_semantics = [#tpu.dimension_semantics<parallel>], iteration_bounds = array<i64: 1>, scalar_prefetch = 0 : i64, scratch_operands = 0 : i64, tpu.core_type = #tpu.core_type<tc>, window_params = [{transform_indices = @transform_0, window_bounds = array<i64: 16, 512>}, {transform_indices = @transform_1, window_bounds = array<i64: 16, 128>}, {pipeline_mode = #tpu.pipeline_mode<synchronous>, transform_indices = @transform_2, window_bounds = array<i64: 512, 128>}, {pipeline_mode = #tpu.pipeline_mode<synchronous>, transform_indices = @transform_3, window_bounds = array<i64: 1, 128>}, {pipeline_mode = #tpu.pipeline_mode<synchronous>, transform_indices = @transform_4, window_bounds = array<i64: 1, 128>}, {pipeline_mode = #tpu.pipeline_mode<synchronous>, transform_indices = @transform_5, window_bounds = array<i64: 1, 128>}, {transform_indices = @transform_6, window_bounds = array<i64: 16, 128>}]} {
    %c0 = arith.constant 0 : index
    %c0_0 = arith.constant 0 : index
    %0 = vector.load %arg4[%c0, %c0_0] : memref<1x128xf32, #tpu.memory_space<vmem>>, vector<1x128xf32>
    %c0_1 = arith.constant 0 : index
    %c0_2 = arith.constant 0 : index
    %1 = vector.load %arg5[%c0_1, %c0_2] : memref<1x128xf32, #tpu.memory_space<vmem>>, vector<1x128xf32>
    %c0_3 = arith.constant 0 : index
    %c0_4 = arith.constant 0 : index
    %2 = vector.load %arg6[%c0_3, %c0_4] : memref<1x128xf32, #tpu.memory_space<vmem>>, vector<1x128xf32>
    %c0_5 = arith.constant 0 : index
    %c0_6 = arith.constant 0 : index
    %3 = vector.load %arg1[%c0_5, %c0_6] : memref<16x512xf32, #tpu.memory_space<vmem>>, vector<16x512xf32>
    %c0_7 = arith.constant 0 : index
    %c0_8 = arith.constant 0 : index
    %4 = vector.load %arg3[%c0_7, %c0_8] : memref<512x128xf32, #tpu.memory_space<vmem>>, vector<512x128xf32>
    %cst = arith.constant dense<0.000000e+00> : vector<16x128xf32>
    %5 = tpu.matmul %3, %4, %cst {dimension_numbers = #tpu.dot_dimension_numbers<[1], [0], [0], [1], [0, 0, 1, 1], [], []>} : vector<16x512xf32>, vector<512x128xf32>, vector<16x128xf32> -> vector<16x128xf32>
    %6 = vector.broadcast %0 : vector<1x128xf32> to vector<16x128xf32>
    %7 = arith.addf %5, %6 : vector<16x128xf32>
    %c0_9 = arith.constant 0 : index
    %c0_10 = arith.constant 0 : index
    %8 = vector.load %arg2[%c0_9, %c0_10] : memref<16x128xf32, #tpu.memory_space<vmem>>, vector<16x128xf32>
    %9 = arith.addf %7, %8 : vector<16x128xf32>
    %cst_11 = arith.constant dense<0.000000e+00> : vector<16xf32>
    %10 = vector.multi_reduction <add>, %9, %cst_11 [1] : vector<16x128xf32> to vector<16xf32>
    %11 = vector.shape_cast %10 : vector<16xf32> to vector<16x1xf32>
    %cst_12 = arith.constant 1.280000e+02 : f32
    %12 = vector.broadcast %cst_12 : f32 to vector<16x1xf32>
    %13 = arith.divf %11, %12 : vector<16x1xf32>
    %14 = vector.broadcast %13 : vector<16x1xf32> to vector<16x128xf32>
    %15 = arith.subf %9, %14 : vector<16x128xf32>
    %16 = arith.mulf %15, %15 : vector<16x128xf32>
    %cst_13 = arith.constant dense<0.000000e+00> : vector<16xf32>
    %17 = vector.multi_reduction <add>, %16, %cst_13 [1] : vector<16x128xf32> to vector<16xf32>
    %18 = vector.shape_cast %17 : vector<16xf32> to vector<16x1xf32>
    %cst_14 = arith.constant 1.280000e+02 : f32
    %19 = vector.broadcast %cst_14 : f32 to vector<16x1xf32>
    %20 = arith.divf %18, %19 : vector<16x1xf32>
    %cst_15 = arith.constant 9.99999996E-13 : f32
    %21 = vector.broadcast %cst_15 : f32 to vector<16x1xf32>
    %22 = arith.addf %20, %21 : vector<16x1xf32>
    %23 = math.rsqrt %22 : vector<16x1xf32>
    %24 = vector.broadcast %23 : vector<16x1xf32> to vector<16x128xf32>
    %25 = arith.mulf %15, %24 : vector<16x128xf32>
    %26 = vector.broadcast %1 : vector<1x128xf32> to vector<16x128xf32>
    %27 = arith.mulf %25, %26 : vector<16x128xf32>
    %28 = vector.broadcast %2 : vector<1x128xf32> to vector<16x128xf32>
    %29 = arith.addf %27, %28 : vector<16x128xf32>
    %c0_16 = arith.constant 0 : index
    %c0_17 = arith.constant 0 : index
    %30 = vector.load %arg7[%c0_16, %c0_17] : memref<16x128xf32, #tpu.memory_space<vmem>>, vector<16x128xf32>
    tpu.vector_store %arg7[%c0_16, %c0_17], %29 {strides = array<i32>} : memref<16x128xf32, #tpu.memory_space<vmem>>, vector<16x128xf32>,
    return
  }
  func.func @transform_0(%arg0: i32) -> (i32, i32) {
    %c0_i32 = arith.constant 0 : i32
    %c0_i32_0 = arith.constant 0 : i32
    return %arg0, %c0_i32 : i32, i32
  }
  func.func @transform_1(%arg0: i32) -> (i32, i32) {
    %c0_i32 = arith.constant 0 : i32
    %c0_i32_0 = arith.constant 0 : i32
    return %arg0, %c0_i32 : i32, i32
  }
  func.func @transform_2(%arg0: i32) -> (i32, i32) {
    %c0_i32 = arith.constant 0 : i32
    %c0_i32_0 = arith.constant 0 : i32
    %c0_i32_1 = arith.constant 0 : i32
    return %c0_i32, %c0_i32_0 : i32, i32
  }
  func.func @transform_3(%arg0: i32) -> (i32, i32) {
    %c0_i32 = arith.constant 0 : i32
    %c0_i32_0 = arith.constant 0 : i32
    %c0_i32_1 = arith.constant 0 : i32
    return %c0_i32, %c0_i32_0 : i32, i32
  }
  func.func @transform_4(%arg0: i32) -> (i32, i32) {
    %c0_i32 = arith.constant 0 : i32
    %c0_i32_0 = arith.constant 0 : i32
    %c0_i32_1 = arith.constant 0 : i32
    return %c0_i32, %c0_i32_0 : i32, i32
  }
  func.func @transform_5(%arg0: i32) -> (i32, i32) {
    %c0_i32 = arith.constant 0 : i32
    %c0_i32_0 = arith.constant 0 : i32
    %c0_i32_1 = arith.constant 0 : i32
    return %c0_i32, %c0_i32_0 : i32, i32
  }
  func.func @transform_6(%arg0: i32) -> (i32, i32) {
    %c0_i32 = arith.constant 0 : i32
    %c0_i32_0 = arith.constant 0 : i32
    return %arg0, %c0_i32 : i32, i32
  }
}

</mosaic_0001>

<bundles_post_ra>
// kernel: tpu_custom_call.1
= control target key start
LH: loop header
LB: loop body
LE: loop exit
PB: predicated region body
PF: predicated region fallthrough
CT: control target
= control target key end

     0   :  { %11 = vsyncpa [#allocation3], 0  ;;  %s518_s0 = inlined_call_operand.hbm [shape: f32[16,512], index: 0, kind: input, shape index: {}]   ;;  %s519_s1 = inlined_call_operand.hbm [shape: f32[16,128], index: 1, kind: input, shape index: {}]   ;;  %s520_s2 = inlined_call_operand.hbm [shape: f32[512,128], index: 2, kind: input, shape index: {}]   ;;  %s521_s3 = inlined_call_operand.vmem [shape: f32[1,128], index: 3, kind: input, shape index: {}]   ;;  %s522_s4 = inlined_call_operand.vmem [shape: f32[1,128], index: 4, kind: input, shape index: {}]   ;;  %s523_s5 = inlined_call_operand.vmem [shape: f32[1,128], index: 5, kind: input, shape index: {}]   ;;  %s524_s6 = inlined_call_operand.hbm [shape: f32[16,128], index: 6, kind: output, shape index: {}]  }
   0x1   :  { %12 = vsyncpa [#allocation6], 0  ;;  %s31_s23 = sshll.u32 %s519_s1, 4  ;;  %s32_s23 = int_to_ptr.hbm [resolvable:$true] %s31_s23 }
   0x2   :  { %13 = vsyncpa [#allocation4], 0  ;;  %s444_s24 = smov [#allocation5]   ;;  %s18_s28 = sshll.u32 %s518_s0, 4  ;;  %s19_s28 = int_to_ptr.hbm [resolvable:$true] %s18_s28 }
   0x3   :  { %s33_s25 = sshll.u32 %s444_s24, 4  ;;  %s445_s29 = smov 128   ;;  %s34_s25 = int_to_ptr.vmem [resolvable:$true] %s33_s25 }
   0x4   :  { %s446_s30 = smov 8   ;;  %s447_s7 = smov [#allocation2]  }
   0x5   :  { %39 = dma.hbm_to_vmem [thread:$0]  %s32_s23, 256, %s34_s25, [#allocation6], %s445_s29, %s445_s29, %s446_s30  }
   0x6   :  { %s20_s8 = sshll.u32 %s447_s7, 4  ;;  %s448_s1 = smov 512   ;;  %s21_s8 = int_to_ptr.vmem [resolvable:$true] %s20_s8 }
   0x7   :  { %s449_s9 = smov 32   ;;  %s44_s12 = sshll.u32 %s520_s2, 4  ;;  %s45_s12 = int_to_ptr.hbm [resolvable:$true] %s44_s12 }
   0x8   :  { %26 = dma.hbm_to_vmem [thread:$0]  %s19_s28, 1024, %s21_s8, [#allocation3], %s448_s1, %s448_s1, %s449_s9  }
   0x9   :  { %s450_s13 = smov [#allocation7]  }
   0xa   :  { %s46_s0 = sshll.u32 %s450_s13, 4  ;;  %s47_s0 = int_to_ptr.vmem [resolvable:$true] %s46_s0 }
   0xb   :  { %52 = dma.hbm_to_vmem [thread:$0]  %s45_s12, 8192, %s47_s0, [#allocation6], %s445_s29, %s445_s29, %s446_s30  }
   0xc   :  { %438 = dma.done.wait [#allocation3], 1024  }
   0xd   :  { %439 = vsyncadd [#allocation3], 4294966272 }
   0xe   :  { %440 = dma.done.wait [#allocation6], 8448  }
   0xf   :  { %441 = vsyncadd [#allocation6], 4294958848  ;;  %v129_v0 = vld [vmem:[#allocation7 + $0x178] sm:$0xff]  ;;  %v128_v2 = vld [vmem:[#allocation7 + $0x170] sm:$0xff]  ;;  %s452_s18 = smov [#allocation8]   ;;  %s310_s21 = sshll.u32 %s524_s6, 4  ;;  %s311_s21 = int_to_ptr.hbm [resolvable:$true] %s310_s21 }
  0x10   :  { %v97_v1 = vld [vmem:[#allocation7 + $0x78] sm:$0xff]  ;;  %195 = vmatpush.msra.mxu2 %v129_v0  ;;  %v96_v4 = vld [vmem:[#allocation7 + $0x70] sm:$0xff]  ;;  %v127_v6 = vld [vmem:[#allocation7 + $0x168] sm:$0xff] }
  0x11   :  { %149 = vmatpush.msra.mxu0 %v97_v1  ;;  %v145_v3 = vld [vmem:[#allocation7 + $0x1f8] sm:$0xff]  ;;  %v144_v7 = vld [vmem:[#allocation7 + $0x1f0] sm:$0xff]  ;;  %v95_v8 = vld [vmem:[#allocation7 + $0x68] sm:$0xff] }
  0x12   :  { %v113_v5 = vld [vmem:[#allocation7 + $0xf8] sm:$0xff]  ;;  %218 = vmatpush.msra.mxu3 %v145_v3  ;;  %196 = vmatpush.msra.mxu2 %v128_v2  ;;  %v112_v9 = vld [vmem:[#allocation7 + $0xf0] sm:$0xff]  ;;  %v143_v10 = vld [vmem:[#allocation7 + $0x1e8] sm:$0xff] }
  0x13   :  { %172 = vmatpush.msra.mxu1 %v113_v5  ;;  %150 = vmatpush.msra.mxu0 %v96_v4  ;;  %v126_v11 = vld [vmem:[#allocation7 + $0x160] sm:$0xff]  ;;  %v111_v13 = vld [vmem:[#allocation7 + $0xe8] sm:$0xff]  ;;  %v125_v16 = vld [vmem:[#allocation7 + $0x158] sm:$0xff] }
  0x14   :  { %219 = vmatpush.msra.mxu3 %v144_v7  ;;  %v94_v12 = vld [vmem:[#allocation7 + $0x60] sm:$0xff]  ;;  %197 = vmatpush.msra.mxu2 %v127_v6  ;;  %v93_v17 = vld [vmem:[#allocation7 + $0x58] sm:$0xff]  ;;  %v124_v20 = vld [vmem:[#allocation7 + $0x150] sm:$0xff] }
  0x15   :  { %173 = vmatpush.msra.mxu1 %v112_v9  ;;  %151 = vmatpush.msra.mxu0 %v95_v8  ;;  %v142_v14 = vld [vmem:[#allocation7 + $0x1e0] sm:$0xff]  ;;  %v141_v18 = vld [vmem:[#allocation7 + $0x1d8] sm:$0xff]  ;;  %v92_v21 = vld [vmem:[#allocation7 + $0x50] sm:$0xff] }
  0x16   :  { %v110_v15 = vld [vmem:[#allocation7 + $0xe0] sm:$0xff]  ;;  %220 = vmatpush.msra.mxu3 %v143_v10  ;;  %198 = vmatpush.msra.mxu2 %v126_v11  ;;  %v109_v19 = vld [vmem:[#allocation7 + $0xd8] sm:$0xff]  ;;  %v140_v22 = vld [vmem:[#allocation7 + $0x1d0] sm:$0xff] }
  0x17   :  { %174 = vmatpush.msra.mxu1 %v111_v13  ;;  %152 = vmatpush.msra.mxu0 %v94_v12  ;;  %v108_v23 = vld [vmem:[#allocation7 + $0xd0] sm:$0xff]  ;;  %v123_v24 = vld [vmem:[#allocation7 + $0x148] sm:$0xff]  ;;  %v122_v28 = vld [vmem:[#allocation7 + $0x140] sm:$0xff] }
  0x18   :  { %221 = vmatpush.msra.mxu3 %v142_v14  ;;  %199 = vmatpush.msra.mxu2 %v125_v16  ;;  %v91_v25 = vld [vmem:[#allocation7 + $0x48] sm:$0xff]  ;;  %v90_v29 = vld [vmem:[#allocation7 + $0x40] sm:$0xff]  ;;  %v121_v32 = vld [vmem:[#allocation7 + $0x138] sm:$0xff] }
  0x19   :  { %175 = vmatpush.msra.mxu1 %v110_v15  ;;  %153 = vmatpush.msra.mxu0 %v93_v17  ;;  %v139_v26 = vld [vmem:[#allocation7 + $0x1c8] sm:$0xff]  ;;  %v138_v30 = vld [vmem:[#allocation7 + $0x1c0] sm:$0xff]  ;;  %v89_v33 = vld [vmem:[#allocation7 + $0x38] sm:$0xff] }
  0x1a   :  { %222 = vmatpush.msra.mxu3 %v141_v18  ;;  %200 = vmatpush.msra.mxu2 %v124_v20  ;;  %v107_v27 = vld [vmem:[#allocation7 + $0xc8] sm:$0xff]  ;;  %v106_v31 = vld [vmem:[#allocation7 + $0xc0] sm:$0xff]  ;;  %v137_v34 = vld [vmem:[#allocation7 + $0x1b8] sm:$0xff] }
  0x1b   :  { %176 = vmatpush.msra.mxu1 %v109_v19  ;;  %154 = vmatpush.msra.mxu0 %v92_v21  ;;  %v105_v35 = vld [vmem:[#allocation7 + $0xb8] sm:$0xff]  ;;  %v120_v36 = vld [vmem:[#allocation7 + $0x130] sm:$0xff]  ;;  %v119_v40 = vld [vmem:[#allocation7 + $0x128] sm:$0xff] }
  0x1c   :  { %223 = vmatpush.msra.mxu3 %v140_v22  ;;  %201 = vmatpush.msra.mxu2 %v123_v24  ;;  %v88_v37 = vld [vmem:[#allocation7 + $0x30] sm:$0xff]  ;;  %v87_v41 = vld [vmem:[#allocation7 + $0x28] sm:$0xff]  ;;  %v118_v44 = vld [vmem:[#allocation7 + $0x120] sm:$0xff] }
  0x1d   :  { %177 = vmatpush.msra.mxu1 %v108_v23  ;;  %155 = vmatpush.msra.mxu0 %v91_v25  ;;  %v136_v38 = vld [vmem:[#allocation7 + $0x1b0] sm:$0xff]  ;;  %v135_v42 = vld [vmem:[#allocation7 + $0x1a8] sm:$0xff]  ;;  %v86_v45 = vld [vmem:[#allocation7 + $0x20] sm:$0xff] }
  0x1e   :  { %224 = vmatpush.msra.mxu3 %v139_v26  ;;  %202 = vmatpush.msra.mxu2 %v122_v28  ;;  %v104_v39 = vld [vmem:[#allocation7 + $0xb0] sm:$0xff]  ;;  %v103_v43 = vld [vmem:[#allocation7 + $0xa8] sm:$0xff]  ;;  %v134_v46 = vld [vmem:[#allocation7 + $0x1a0] sm:$0xff] }
  0x1f   :  { %178 = vmatpush.msra.mxu1 %v107_v27  ;;  %156 = vmatpush.msra.mxu0 %v90_v29  ;;  %v102_v47 = vld [vmem:[#allocation7 + $0xa0] sm:$0xff]  ;;  %v117_v48 = vld [vmem:[#allocation7 + $0x118] sm:$0xff]  ;;  %v116_v50 = vld [vmem:[#allocation7 + $0x110] sm:$0xff]  ;;  %v451_v29 = vmov 128.0  }
  0x20   :  { %225 = vmatpush.msra.mxu3 %v138_v30  ;;  %203 = vmatpush.msra.mxu2 %v121_v32  ;;  %v85_v49 = vld [vmem:[#allocation7 + $0x18] sm:$0xff]  ;;  %v84_v53 = vld [vmem:[#allocation7 + $0x10] sm:$0xff]  ;;  %v115_v56 = vld [vmem:[#allocation7 + $0x108] sm:$0xff]  ;;  %336 = vrcp.f32 %v451_v29 }
  0x21   :  { %179 = vmatpush.msra.mxu1 %v106_v31  ;;  %157 = vmatpush.msra.mxu0 %v89_v33  ;;  %v133_v51 = vld [vmem:[#allocation7 + $0x198] sm:$0xff]  ;;  %v132_v54 = vld [vmem:[#allocation7 + $0x190] sm:$0xff]  ;;  %v83_v57 = vld [vmem:[#allocation7 + $0x8] sm:$0xff] }
  0x22   :  { %226 = vmatpush.msra.mxu3 %v137_v34  ;;  %204 = vmatpush.msra.mxu2 %v120_v36  ;;  %v101_v52 = vld [vmem:[#allocation7 + $0x98] sm:$0xff]  ;;  %v100_v55 = vld [vmem:[#allocation7 + $0x90] sm:$0xff]  ;;  %v131_v58 = vld [vmem:[#allocation7 + $0x188] sm:$0xff] }
  0x23   :  { %180 = vmatpush.msra.mxu1 %v105_v35  ;;  %158 = vmatpush.msra.mxu0 %v88_v37  ;;  %v99_v59 = vld [vmem:[#allocation7 + $0x88] sm:$0xff]  ;;  %v114_v60 = vld [vmem:[#allocation7 + $0x100] sm:$0xff]  ;;  %v74_v0 = vld [vmem:[#allocation2] sm:$0xff] }
  0x24   :  { %227 = vmatpush.msra.mxu3 %v136_v38  ;;  %205 = vmatpush.msra.mxu2 %v119_v40  ;;  %v82_v61 = vld [vmem:[#allocation7] sm:$0xff]  ;;  %v77_v1 = vld [vmem:[#allocation2 + $0x18] sm:$0xff]  ;;  %v75_v3 = vld [vmem:[#allocation2 + $0x8] sm:$0xff] }
  0x25   :  { %181 = vmatpush.msra.mxu1 %v104_v39  ;;  %159 = vmatpush.msra.mxu0 %v87_v41  ;;  %v76_v62 = vld [vmem:[#allocation2 + $0x10] sm:$0xff]  ;;  %v78_v5 = vld [vmem:[#allocation2 + $0x20] sm:$0xff]  ;;  %v81_v6 = vld [vmem:[#allocation2 + $0x38] sm:$0xff] }
  0x26   :  { %228 = vmatpush.msra.mxu3 %v135_v42  ;;  %206 = vmatpush.msra.mxu2 %v118_v44  ;;  %v130_v63 = vld [vmem:[#allocation7 + $0x180] sm:$0xff]  ;;  %v79_v7 = vld [vmem:[#allocation2 + $0x28] sm:$0xff]  ;;  %v333_v8 = vld [vmem:[%s521_s3] ss:$0 sm:$0xff]  ;;  %v337_v30 = vpop.eup %336 }
  0x27   :  { %182 = vmatpush.msra.mxu1 %v103_v43  ;;  %160 = vmatpush.msra.mxu0 %v86_v45  ;;  %v98_v2 = vld [vmem:[#allocation7 + $0x80] sm:$0xff]  ;;  %v241_v16 = vld [vmem:[#allocation5] sm:$0xff]  ;;  %v242_v26 = vld [vmem:[#allocation5 + $0x8] sm:$0xff]  ;;  %v250_v31 = vmul.f32 128.0, %v337_v30  ;;  %vm254_vm0 = vweird.f32 %v337_v30 }
  0x28   :  { %229 = vmatpush.msra.mxu3 %v134_v46  ;;  %207 = vmatpush.msra.mxu2 %v117_v48  ;;  %v80_v4 = vld [vmem:[#allocation2 + $0x30] sm:$0xff] }
  0x29   :  { %183 = vmatpush.msra.mxu1 %v102_v47  ;;  %161 = vmatpush.msra.mxu0 %v85_v49  ;;  %v251_v32 = vsub.f32 1.0, %v250_v31 }
  0x2a   :  { %230 = vmatpush.msra.mxu3 %v133_v51  ;;  %208 = vmatpush.msra.mxu2 %v116_v50 }
  0x2b   :  { %184 = vmatpush.msra.mxu1 %v101_v52  ;;  %162 = vmatpush.msra.mxu0 %v84_v53  ;;  %v252_v33 = vmul.f32 %v337_v30, %v251_v32 }
  0x2c   :  { %231 = vmatpush.msra.mxu3 %v132_v54  ;;  %209 = vmatpush.msra.mxu2 %v115_v56 }
  0x2d   :  { %185 = vmatpush.msra.mxu1 %v100_v55  ;;  %163 = vmatpush.msra.mxu0 %v83_v57  ;;  %v253_v34 = vadd.f32 %v337_v30, %v252_v33 }
  0x2e   :  { %232 = vmatpush.msra.mxu3 %v131_v58  ;;  %210 = vmatpush.msra.mxu2 %v114_v60  ;;  %v334_v58 = vld [vmem:[%s522_s4] ss:$0 sm:$0xff]  ;;  %s308_s4 = sshll.u32 %s452_s18, 4  ;;  %s309_s4 = int_to_ptr.vmem [resolvable:$true] %s308_s4 }
  0x2f   :  { %186 = vmatpush.msra.mxu1 %v99_v59  ;;  %164 = vmatpush.msra.mxu0 %v82_v61  ;;  %v255_v35 = vsel %vm254_vm0, %v337_v30, %v253_v34 }
  0x30   :  { %211 = vmatmul.f32.vlgmr.msra.gmra.mxu2 %v76_v62  ;;  %233 = vmatpush.msra.mxu3 %v130_v63  ;;  %v335_v62 = vld [vmem:[%s523_s5] ss:$0 sm:$0xff] }
  0x31   :  { %165 = vmatmul.f32.vlgmr.msra.gmra.mxu0 %v74_v0  ;;  %234 = vmatmul.f32.vlgmr.msra.gmra.mxu3 %v77_v1 }
  0x32   :  { %187 = vmatpush.msra.mxu1 %v98_v2 }
  0x33   :  { %188 = vmatmul.f32.vlgmr.msra.gmra.mxu1 %v75_v3 }
  0x38   :  { %214 = vmatmul.f32.gmra.mxu2 %v80_v4 }
  0x39   :  { %168 = vmatmul.f32.gmra.mxu0 %v78_v5  ;;  %237 = vmatmul.f32.gmra.mxu3 %v81_v6 }
  0x3b   :  { %191 = vmatmul.f32.gmra.mxu1 %v79_v7 }
  0xae   :  { %v166_v9 = vpop.f32.mrf.mxu0 }
  0xaf   :  { %v167_v10 = vadd.f32 %v333_v8, %v166_v9 }
  0xb0   :  { %v189_v11 = vpop.f32.mrf.mxu1 }
  0xb1   :  { %v190_v12 = vadd.f32 %v189_v11, %v167_v10 }
  0xb3   :  { %v212_v13 = vpop.f32.mrf.mxu2 }
  0xb4   :  { %v213_v14 = vadd.f32 %v212_v13, %v190_v12  ;;  %v235_v15 = vpop.f32.mrf.mxu3 }
  0xb6   :  { %v236_v17 = vadd.f32 %v235_v15, %v213_v14  ;;  %v169_v18 = vpop.f32.mrf.mxu0 }
  0xb7   :  { %v170_v19 = vadd.f32 %v333_v8, %v169_v18 }
  0xb8   :  { %v192_v20 = vpop.f32.mrf.mxu1  ;;  %v243_v21 = vadd.f32 %v241_v16, %v236_v17 }
  0xb9   :  { %v193_v22 = vadd.f32 %v192_v20, %v170_v19 }
  0xba   :  { %245 = vadd.xlane.f32.xlu0 %v243_v21 }
  0xbb   :  { %v215_v23 = vpop.f32.mrf.mxu2 }
  0xbc   :  { %v216_v24 = vadd.f32 %v215_v23, %v193_v22  ;;  %v238_v25 = vpop.f32.mrf.mxu3 }
  0xbe   :  { %v239_v27 = vadd.f32 %v238_v25, %v216_v24 }
  0xc0   :  { %v244_v28 = vadd.f32 %v242_v26, %v239_v27 }
  0xc2   :  { %247 = vadd.xlane.f32.xlu0 %v244_v28 }
 0x12d   :  { %v246_v36 = vpop.xlane.xlu0 %245 }
 0x12e   :  { %v256_v37 = vmul.f32 %v255_v35, %v246_v36 }
 0x130   :  { %v258_v38 = vsub.f32 %v243_v21, %v256_v37 }
 0x132   :  { %v260_v39 = vmul.f32 %v258_v38, %v258_v38 }
 0x134   :  { %262 = vadd.xlane.f32.xlu1 %v260_v39 }
 0x135   :  { %v248_v40 = vpop.xlane.xlu0 %247 }
 0x136   :  { %v257_v41 = vmul.f32 %v255_v35, %v248_v40 }
 0x138   :  { %v259_v42 = vsub.f32 %v244_v28, %v257_v41 }
 0x13a   :  { %v261_v43 = vmul.f32 %v259_v42, %v259_v42 }
 0x13c   :  { %264 = vadd.xlane.f32.xlu1 %v261_v43 }
 0x1a7   :  { %v263_v44 = vpop.xlane.xlu1 %262 }
 0x1a8   :  { %v266_v45 = vmul.f32 %v263_v44, %v255_v35 }
 0x1aa   :  { %v268_v46 = vadd.f32 1e-12, %v266_v45 }
 0x1ac   :  { %338 = vrsqrt.f32 %v268_v46  ;;  %vm276_vm2 = vweird.f32 %v268_v46 }
 0x1af   :  { %v265_v47 = vpop.xlane.xlu1 %264 }
 0x1b0   :  { %v267_v48 = vmul.f32 %v265_v47, %v255_v35 }
 0x1b2   :  { %v339_v49 = vpop.eup %338  ;;  %v269_v50 = vadd.f32 1e-12, %v267_v48 }
 0x1b3   :  { %v271_v51 = vmul.f32 %v339_v49, %v268_v46  ;;  %vm277_vm1 = vweird.f32 %v339_v49 }
 0x1b4   :  { %340 = vrsqrt.f32 %v269_v50  ;;  %vm278_vm3 = vmor %vm276_vm2, %vm277_vm1  ;;  %vm286_vm5 = vweird.f32 %v269_v50 }
 0x1b5   :  { %v272_v52 = vmul.f32 %v339_v49, %v271_v51 }
 0x1b7   :  { %v273_v53 = vmul.f32 0.5, %v272_v52 }
 0x1b9   :  { %v274_v54 = vsub.f32 1.5, %v273_v53 }
 0x1ba   :  { %v341_v55 = vpop.eup %340 }
 0x1bb   :  { %v275_v56 = vmul.f32 %v339_v49, %v274_v54  ;;  %v281_v57 = vmul.f32 %v341_v55, %v269_v50  ;;  %vm287_vm4 = vweird.f32 %v341_v55 }
 0x1bc   :  { %vm288_vm6 = vmor %vm286_vm5, %vm287_vm4 }
 0x1bd   :  { %v279_v59 = vsel %vm278_vm3, %v339_v49, %v275_v56  ;;  %v282_v60 = vmul.f32 %v341_v55, %v281_v57 }
 0x1be   :  { %v290_v61 = vmul.f32 %v279_v59, %v258_v38 }
 0x1bf   :  { %v283_v63 = vmul.f32 0.5, %v282_v60 }
 0x1c0   :  { %v295_v0 = vmul.f32 %v334_v58, %v290_v61 }
 0x1c1   :  { %v284_v1 = vsub.f32 1.5, %v283_v63 }
 0x1c2   :  { %v300_v2 = vadd.f32 %v335_v62, %v295_v0 }
 0x1c3   :  { %v285_v3 = vmul.f32 %v341_v55, %v284_v1 }
 0x1c4   :  { %302 = vst [vmem:[#allocation8] sm:$0xff] %v300_v2 }
 0x1c5   :  { %v289_v4 = vsel %vm288_vm6, %v341_v55, %v285_v3 }
 0x1c6   :  { %v291_v5 = vmul.f32 %v289_v4, %v259_v42 }
 0x1c8   :  { %v296_v6 = vmul.f32 %v334_v58, %v291_v5 }
 0x1ca   :  { %v301_v7 = vadd.f32 %v335_v62, %v296_v6 }
 0x1cc   :  { %303 = vst [vmem:[#allocation8 + $0x8] sm:$0xff] %v301_v7 }
 0x1cd   :  { %316 = dma.vmem_to_hbm [thread:$0]  %s309_s4, 256, %s311_s21, [#allocation4], %s445_s29, %s445_s29, %s446_s30  }
 0x1ce   :  { %442 = dma.done.wait [#allocation4], 256  }
 0x1cf   :  { %443 = vsyncadd [#allocation4], 4294967040 }
 0x1d0   :  { %321 = vsyncpa [#allocation3], 1 }
 0x1d1   :  { %322 = vsyncpa [#allocation6], 1 }
 0x1d2   :  { %323 = vsyncpa [#allocation4], 1 }

// kernel: tpu_custom_call.1
= control target key start
LH: loop header
LB: loop body
LE: loop exit
PB: predicated region body
PF: predicated region fallthrough
CT: control target
= control target key end

     0   :  { %11 = vsyncpa [#allocation3], 0  ;;  %s518_s0 = inlined_call_operand.hbm [shape: f32[16,512], index: 0, kind: input, shape index: {}]   ;;  %s519_s1 = inlined_call_operand.hbm [shape: f32[16,128], index: 1, kind: input, shape index: {}]   ;;  %s520_s2 = inlined_call_operand.hbm [shape: f32[512,128], index: 2, kind: input, shape index: {}]   ;;  %s521_s3 = inlined_call_operand.vmem [shape: f32[1,128], index: 3, kind: input, shape index: {}]   ;;  %s522_s4 = inlined_call_operand.vmem [shape: f32[1,128], index: 4, kind: input, shape index: {}]   ;;  %s523_s5 = inlined_call_operand.vmem [shape: f32[1,128], index: 5, kind: input, shape index: {}]   ;;  %s524_s6 = inlined_call_operand.hbm [shape: f32[16,128], index: 6, kind: output, shape index: {}]  }
   0x1   :  { %12 = vsyncpa [#allocation6], 0  ;;  %s31_s23 = sshll.u32 %s519_s1, 4  ;;  %s32_s23 = int_to_ptr.hbm [resolvable:$true] %s31_s23 }
   0x2   :  { %13 = vsyncpa [#allocation4], 0  ;;  %s444_s24 = smov [#allocation5]   ;;  %s18_s28 = sshll.u32 %s518_s0, 4  ;;  %s19_s28 = int_to_ptr.hbm [resolvable:$true] %s18_s28 }
   0x3   :  { %s33_s25 = sshll.u32 %s444_s24, 4  ;;  %s445_s29 = smov 128   ;;  %s34_s25 = int_to_ptr.vmem [resolvable:$true] %s33_s25 }
   0x4   :  { %s446_s30 = smov 8   ;;  %s447_s7 = smov [#allocation2]  }
   0x5   :  { %39 = dma.hbm_to_vmem [thread:$0]  %s32_s23, 256, %s34_s25, [#allocation6], %s445_s29, %s445_s29, %s446_s30  }
   0x6   :  { %s20_s8 = sshll.u32 %s447_s7, 4  ;;  %s448_s1 = smov 512   ;;  %s21_s8 = int_to_ptr.vmem [resolvable:$true] %s20_s8 }
   0x7   :  { %s449_s9 = smov 32   ;;  %s44_s12 = sshll.u32 %s520_s2, 4  ;;  %s45_s12 = int_to_ptr.hbm [resolvable:$true] %s44_s12 }
   0x8   :  { %26 = dma.hbm_to_vmem [thread:$0]  %s19_s28, 1024, %s21_s8, [#allocation3], %s448_s1, %s448_s1, %s449_s9  }
   0x9   :  { %s450_s13 = smov [#allocation7]  }
   0xa   :  { %s46_s0 = sshll.u32 %s450_s13, 4  ;;  %s47_s0 = int_to_ptr.vmem [resolvable:$true] %s46_s0 }
   0xb   :  { %52 = dma.hbm_to_vmem [thread:$0]  %s45_s12, 8192, %s47_s0, [#allocation6], %s445_s29, %s445_s29, %s446_s30  }
   0xc   :  { %438 = dma.done.wait [#allocation3], 1024  }
   0xd   :  { %439 = vsyncadd [#allocation3], 4294966272 }
   0xe   :  { %440 = dma.done.wait [#allocation6], 8448  }
   0xf   :  { %441 = vsyncadd [#allocation6], 4294958848  ;;  %v129_v0 = vld [vmem:[#allocation7 + $0x178] sm:$0xff]  ;;  %v128_v2 = vld [vmem:[#allocation7 + $0x170] sm:$0xff]  ;;  %s452_s18 = smov [#allocation8]   ;;  %s310_s21 = sshll.u32 %s524_s6, 4  ;;  %s311_s21 = int_to_ptr.hbm [resolvable:$true] %s310_s21 }
  0x10   :  { %v97_v1 = vld [vmem:[#allocation7 + $0x78] sm:$0xff]  ;;  %195 = vmatpush.msra.mxu2 %v129_v0  ;;  %v96_v4 = vld [vmem:[#allocation7 + $0x70] sm:$0xff]  ;;  %v127_v6 = vld [vmem:[#allocation7 + $0x168] sm:$0xff] }
  0x11   :  { %149 = vmatpush.msra.mxu0 %v97_v1  ;;  %v145_v3 = vld [vmem:[#allocation7 + $0x1f8] sm:$0xff]  ;;  %v144_v7 = vld [vmem:[#allocation7 + $0x1f0] sm:$0xff]  ;;  %v95_v8 = vld [vmem:[#allocation7 + $0x68] sm:$0xff] }
  0x12   :  { %v113_v5 = vld [vmem:[#allocation7 + $0xf8] sm:$0xff]  ;;  %218 = vmatpush.msra.mxu3 %v145_v3  ;;  %196 = vmatpush.msra.mxu2 %v128_v2  ;;  %v112_v9 = vld [vmem:[#allocation7 + $0xf0] sm:$0xff]  ;;  %v143_v10 = vld [vmem:[#allocation7 + $0x1e8] sm:$0xff] }
  0x13   :  { %172 = vmatpush.msra.mxu1 %v113_v5  ;;  %150 = vmatpush.msra.mxu0 %v96_v4  ;;  %v126_v11 = vld [vmem:[#allocation7 + $0x160] sm:$0xff]  ;;  %v111_v13 = vld [vmem:[#allocation7 + $0xe8] sm:$0xff]  ;;  %v125_v16 = vld [vmem:[#allocation7 + $0x158] sm:$0xff] }
  0x14   :  { %219 = vmatpush.msra.mxu3 %v144_v7  ;;  %v94_v12 = vld [vmem:[#allocation7 + $0x60] sm:$0xff]  ;;  %197 = vmatpush.msra.mxu2 %v127_v6  ;;  %v93_v17 = vld [vmem:[#allocation7 + $0x58] sm:$0xff]  ;;  %v124_v20 = vld [vmem:[#allocation7 + $0x150] sm:$0xff] }
  0x15   :  { %173 = vmatpush.msra.mxu1 %v112_v9  ;;  %151 = vmatpush.msra.mxu0 %v95_v8  ;;  %v142_v14 = vld [vmem:[#allocation7 + $0x1e0] sm:$0xff]  ;;  %v141_v18 = vld [vmem:[#allocation7 + $0x1d8] sm:$0xff]  ;;  %v92_v21 = vld [vmem:[#allocation7 + $0x50] sm:$0xff] }
  0x16   :  { %v110_v15 = vld [vmem:[#allocation7 + $0xe0] sm:$0xff]  ;;  %220 = vmatpush.msra.mxu3 %v143_v10  ;;  %198 = vmatpush.msra.mxu2 %v126_v11  ;;  %v109_v19 = vld [vmem:[#allocation7 + $0xd8] sm:$0xff]  ;;  %v140_v22 = vld [vmem:[#allocation7 + $0x1d0] sm:$0xff] }
  0x17   :  { %174 = vmatpush.msra.mxu1 %v111_v13  ;;  %152 = vmatpush.msra.mxu0 %v94_v12  ;;  %v108_v23 = vld [vmem:[#allocation7 + $0xd0] sm:$0xff]  ;;  %v123_v24 = vld [vmem:[#allocation7 + $0x148] sm:$0xff]  ;;  %v122_v28 = vld [vmem:[#allocation7 + $0x140] sm:$0xff] }
  0x18   :  { %221 = vmatpush.msra.mxu3 %v142_v14  ;;  %199 = vmatpush.msra.mxu2 %v125_v16  ;;  %v91_v25 = vld [vmem:[#allocation7 + $0x48] sm:$0xff]  ;;  %v90_v29 = vld [vmem:[#allocation7 + $0x40] sm:$0xff]  ;;  %v121_v32 = vld [vmem:[#allocation7 + $0x138] sm:$0xff] }
  0x19   :  { %175 = vmatpush.msra.mxu1 %v110_v15  ;;  %153 = vmatpush.msra.mxu0 %v93_v17  ;;  %v139_v26 = vld [vmem:[#allocation7 + $0x1c8] sm:$0xff]  ;;  %v138_v30 = vld [vmem:[#allocation7 + $0x1c0] sm:$0xff]  ;;  %v89_v33 = vld [vmem:[#allocation7 + $0x38] sm:$0xff] }
  0x1a   :  { %222 = vmatpush.msra.mxu3 %v141_v18  ;;  %200 = vmatpush.msra.mxu2 %v124_v20  ;;  %v107_v27 = vld [vmem:[#allocation7 + $0xc8] sm:$0xff]  ;;  %v106_v31 = vld [vmem:[#allocation7 + $0xc0] sm:$0xff]  ;;  %v137_v34 = vld [vmem:[#allocation7 + $0x1b8] sm:$0xff] }
  0x1b   :  { %176 = vmatpush.msra.mxu1 %v109_v19  ;;  %154 = vmatpush.msra.mxu0 %v92_v21  ;;  %v105_v35 = vld [vmem:[#allocation7 + $0xb8] sm:$0xff]  ;;  %v120_v36 = vld [vmem:[#allocation7 + $0x130] sm:$0xff]  ;;  %v119_v40 = vld [vmem:[#allocation7 + $0x128] sm:$0xff] }
  0x1c   :  { %223 = vmatpush.msra.mxu3 %v140_v22  ;;  %201 = vmatpush.msra.mxu2 %v123_v24  ;;  %v88_v37 = vld [vmem:[#allocation7 + $0x30] sm:$0xff]  ;;  %v87_v41 = vld [vmem:[#allocation7 + $0x28] sm:$0xff]  ;;  %v118_v44 = vld [vmem:[#allocation7 + $0x120] sm:$0xff] }
  0x1d   :  { %177 = vmatpush.msra.mxu1 %v108_v23  ;;  %155 = vmatpush.msra.mxu0 %v91_v25  ;;  %v136_v38 = vld [vmem:[#allocation7 + $0x1b0] sm:$0xff]  ;;  %v135_v42 = vld [vmem:[#allocation7 + $0x1a8] sm:$0xff]  ;;  %v86_v45 = vld [vmem:[#allocation7 + $0x20] sm:$0xff] }
  0x1e   :  { %224 = vmatpush.msra.mxu3 %v139_v26  ;;  %202 = vmatpush.msra.mxu2 %v122_v28  ;;  %v104_v39 = vld [vmem:[#allocation7 + $0xb0] sm:$0xff]  ;;  %v103_v43 = vld [vmem:[#allocation7 + $0xa8] sm:$0xff]  ;;  %v134_v46 = vld [vmem:[#allocation7 + $0x1a0] sm:$0xff] }
  0x1f   :  { %178 = vmatpush.msra.mxu1 %v107_v27  ;;  %156 = vmatpush.msra.mxu0 %v90_v29  ;;  %v102_v47 = vld [vmem:[#allocation7 + $0xa0] sm:$0xff]  ;;  %v117_v48 = vld [vmem:[#allocation7 + $0x118] sm:$0xff]  ;;  %v116_v50 = vld [vmem:[#allocation7 + $0x110] sm:$0xff]  ;;  %v451_v29 = vmov 128.0  }
  0x20   :  { %225 = vmatpush.msra.mxu3 %v138_v30  ;;  %203 = vmatpush.msra.mxu2 %v121_v32  ;;  %v85_v49 = vld [vmem:[#allocation7 + $0x18] sm:$0xff]  ;;  %v84_v53 = vld [vmem:[#allocation7 + $0x10] sm:$0xff]  ;;  %v115_v56 = vld [vmem:[#allocation7 + $0x108] sm:$0xff]  ;;  %336 = vrcp.f32 %v451_v29 }
  0x21   :  { %179 = vmatpush.msra.mxu1 %v106_v31  ;;  %157 = vmatpush.msra.mxu0 %v89_v33  ;;  %v133_v51 = vld [vmem:[#allocation7 + $0x198] sm:$0xff]  ;;  %v132_v54 = vld [vmem:[#allocation7 + $0x190] sm:$0xff]  ;;  %v83_v57 = vld [vmem:[#allocation7 + $0x8] sm:$0xff] }
  0x22   :  { %226 = vmatpush.msra.mxu3 %v137_v34  ;;  %204 = vmatpush.msra.mxu2 %v120_v36  ;;  %v101_v52 = vld [vmem:[#allocation7 + $0x98] sm:$0xff]  ;;  %v100_v55 = vld [vmem:[#allocation7 + $0x90] sm:$0xff]  ;;  %v131_v58 = vld [vmem:[#allocation7 + $0x188] sm:$0xff] }
  0x23   :  { %180 = vmatpush.msra.mxu1 %v105_v35  ;;  %158 = vmatpush.msra.mxu0 %v88_v37  ;;  %v99_v59 = vld [vmem:[#allocation7 + $0x88] sm:$0xff]  ;;  %v114_v60 = vld [vmem:[#allocation7 + $0x100] sm:$0xff]  ;;  %v74_v0 = vld [vmem:[#allocation2] sm:$0xff] }
  0x24   :  { %227 = vmatpush.msra.mxu3 %v136_v38  ;;  %205 = vmatpush.msra.mxu2 %v119_v40  ;;  %v82_v61 = vld [vmem:[#allocation7] sm:$0xff]  ;;  %v77_v1 = vld [vmem:[#allocation2 + $0x18] sm:$0xff]  ;;  %v75_v3 = vld [vmem:[#allocation2 + $0x8] sm:$0xff] }
  0x25   :  { %181 = vmatpush.msra.mxu1 %v104_v39  ;;  %159 = vmatpush.msra.mxu0 %v87_v41  ;;  %v76_v62 = vld [vmem:[#allocation2 + $0x10] sm:$0xff]  ;;  %v78_v5 = vld [vmem:[#allocation2 + $0x20] sm:$0xff]  ;;  %v81_v6 = vld [vmem:[#allocation2 + $0x38] sm:$0xff] }
  0x26   :  { %228 = vmatpush.msra.mxu3 %v135_v42  ;;  %206 = vmatpush.msra.mxu2 %v118_v44  ;;  %v130_v63 = vld [vmem:[#allocation7 + $0x180] sm:$0xff]  ;;  %v79_v7 = vld [vmem:[#allocation2 + $0x28] sm:$0xff]  ;;  %v333_v8 = vld [vmem:[%s521_s3] ss:$0 sm:$0xff]  ;;  %v337_v30 = vpop.eup %336 }
  0x27   :  { %182 = vmatpush.msra.mxu1 %v103_v43  ;;  %160 = vmatpush.msra.mxu0 %v86_v45  ;;  %v98_v2 = vld [vmem:[#allocation7 + $0x80] sm:$0xff]  ;;  %v241_v16 = vld [vmem:[#allocation5] sm:$0xff]  ;;  %v242_v26 = vld [vmem:[#allocation5 + $0x8] sm:$0xff]  ;;  %v250_v31 = vmul.f32 128.0, %v337_v30  ;;  %vm254_vm0 = vweird.f32 %v337_v30 }
  0x28   :  { %229 = vmatpush.msra.mxu3 %v134_v46  ;;  %207 = vmatpush.msra.mxu2 %v117_v48  ;;  %v80_v4 = vld [vmem:[#allocation2 + $0x30] sm:$0xff] }
  0x29   :  { %183 = vmatpush.msra.mxu1 %v102_v47  ;;  %161 = vmatpush.msra.mxu0 %v85_v49  ;;  %v251_v32 = vsub.f32 1.0, %v250_v31 }
  0x2a   :  { %230 = vmatpush.msra.mxu3 %v133_v51  ;;  %208 = vmatpush.msra.mxu2 %v116_v50 }
  0x2b   :  { %184 = vmatpush.msra.mxu1 %v101_v52  ;;  %162 = vmatpush.msra.mxu0 %v84_v53  ;;  %v252_v33 = vmul.f32 %v337_v30, %v251_v32 }
  0x2c   :  { %231 = vmatpush.msra.mxu3 %v132_v54  ;;  %209 = vmatpush.msra.mxu2 %v115_v56 }
  0x2d   :  { %185 = vmatpush.msra.mxu1 %v100_v55  ;;  %163 = vmatpush.msra.mxu0 %v83_v57  ;;  %v253_v34 = vadd.f32 %v337_v30, %v252_v33 }
  0x2e   :  { %232 = vmatpush.msra.mxu3 %v131_v58  ;;  %210 = vmatpush.msra.mxu2 %v114_v60  ;;  %v334_v58 = vld [vmem:[%s522_s4] ss:$0 sm:$0xff]  ;;  %s308_s4 = sshll.u32 %s452_s18, 4  ;;  %s309_s4 = int_to_ptr.vmem [resolvable:$true] %s308_s4 }
  0x2f   :  { %186 = vmatpush.msra.mxu1 %v99_v59  ;;  %164 = vmatpush.msra.mxu0 %v82_v61  ;;  %v255_v35 = vsel %vm254_vm0, %v337_v30, %v253_v34 }
  0x30   :  { %211 = vmatmul.f32.vlgmr.msra.gmra.mxu2 %v76_v62  ;;  %233 = vmatpush.msra.mxu3 %v130_v63  ;;  %v335_v62 = vld [vmem:[%s523_s5] ss:$0 sm:$0xff] }
  0x31   :  { %165 = vmatmul.f32.vlgmr.msra.gmra.mxu0 %v74_v0  ;;  %234 = vmatmul.f32.vlgmr.msra.gmra.mxu3 %v77_v1 }
  0x32   :  { %187 = vmatpush.msra.mxu1 %v98_v2 }
  0x33   :  { %188 = vmatmul.f32.vlgmr.msra.gmra.mxu1 %v75_v3 }
  0x38   :  { %214 = vmatmul.f32.gmra.mxu2 %v80_v4 }
  0x39   :  { %168 = vmatmul.f32.gmra.mxu0 %v78_v5  ;;  %237 = vmatmul.f32.gmra.mxu3 %v81_v6 }
  0x3b   :  { %191 = vmatmul.f32.gmra.mxu1 %v79_v7 }
  0xae   :  { %v166_v9 = vpop.f32.mrf.mxu0 }
  0xaf   :  { %v167_v10 = vadd.f32 %v333_v8, %v166_v9 }
  0xb0   :  { %v189_v11 = vpop.f32.mrf.mxu1 }
  0xb1   :  { %v190_v12 = vadd.f32 %v189_v11, %v167_v10 }
  0xb3   :  { %v212_v13 = vpop.f32.mrf.mxu2 }
  0xb4   :  { %v213_v14 = vadd.f32 %v212_v13, %v190_v12  ;;  %v235_v15 = vpop.f32.mrf.mxu3 }
  0xb6   :  { %v236_v17 = vadd.f32 %v235_v15, %v213_v14  ;;  %v169_v18 = vpop.f32.mrf.mxu0 }
  0xb7   :  { %v170_v19 = vadd.f32 %v333_v8, %v169_v18 }
  0xb8   :  { %v192_v20 = vpop.f32.mrf.mxu1  ;;  %v243_v21 = vadd.f32 %v241_v16, %v236_v17 }
  0xb9   :  { %v193_v22 = vadd.f32 %v192_v20, %v170_v19 }
  0xba   :  { %245 = vadd.xlane.f32.xlu0 %v243_v21 }
  0xbb   :  { %v215_v23 = vpop.f32.mrf.mxu2 }
  0xbc   :  { %v216_v24 = vadd.f32 %v215_v23, %v193_v22  ;;  %v238_v25 = vpop.f32.mrf.mxu3 }
  0xbe   :  { %v239_v27 = vadd.f32 %v238_v25, %v216_v24 }
  0xc0   :  { %v244_v28 = vadd.f32 %v242_v26, %v239_v27 }
  0xc2   :  { %247 = vadd.xlane.f32.xlu0 %v244_v28 }
 0x12d   :  { %v246_v36 = vpop.xlane.xlu0 %245 }
 0x12e   :  { %v256_v37 = vmul.f32 %v255_v35, %v246_v36 }
 0x130   :  { %v258_v38 = vsub.f32 %v243_v21, %v256_v37 }
 0x132   :  { %v260_v39 = vmul.f32 %v258_v38, %v258_v38 }
 0x134   :  { %262 = vadd.xlane.f32.xlu1 %v260_v39 }
 0x135   :  { %v248_v40 = vpop.xlane.xlu0 %247 }
 0x136   :  { %v257_v41 = vmul.f32 %v255_v35, %v248_v40 }
 0x138   :  { %v259_v42 = vsub.f32 %v244_v28, %v257_v41 }
 0x13a   :  { %v261_v43 = vmul.f32 %v259_v42, %v259_v42 }
 0x13c   :  { %264 = vadd.xlane.f32.xlu1 %v261_v43 }
 0x1a7   :  { %v263_v44 = vpop.xlane.xlu1 %262 }
 0x1a8   :  { %v266_v45 = vmul.f32 %v263_v44, %v255_v35 }
 0x1aa   :  { %v268_v46 = vadd.f32 1e-12, %v266_v45 }
 0x1ac   :  { %338 = vrsqrt.f32 %v268_v46  ;;  %vm276_vm2 = vweird.f32 %v268_v46 }
 0x1af   :  { %v265_v47 = vpop.xlane.xlu1 %264 }
 0x1b0   :  { %v267_v48 = vmul.f32 %v265_v47, %v255_v35 }
 0x1b2   :  { %v339_v49 = vpop.eup %338  ;;  %v269_v50 = vadd.f32 1e-12, %v267_v48 }
 0x1b3   :  { %v271_v51 = vmul.f32 %v339_v49, %v268_v46  ;;  %vm277_vm1 = vweird.f32 %v339_v49 }
 0x1b4   :  { %340 = vrsqrt.f32 %v269_v50  ;;  %vm278_vm3 = vmor %vm276_vm2, %vm277_vm1  ;;  %vm286_vm5 = vweird.f32 %v269_v50 }
 0x1b5   :  { %v272_v52 = vmul.f32 %v339_v49, %v271_v51 }
 0x1b7   :  { %v273_v53 = vmul.f32 0.5, %v272_v52 }
 0x1b9   :  { %v274_v54 = vsub.f32 1.5, %v273_v53 }
 0x1ba   :  { %v341_v55 = vpop.eup %340 }
 0x1bb   :  { %v275_v56 = vmul.f32 %v339_v49, %v274_v54  ;;  %v281_v57 = vmul.f32 %v341_v55, %v269_v50  ;;  %vm287_vm4 = vweird.f32 %v341_v55 }
 0x1bc   :  { %vm288_vm6 = vmor %vm286_vm5, %vm287_vm4 }
 0x1bd   :  { %v279_v59 = vsel %vm278_vm3, %v339_v49, %v275_v56  ;;  %v282_v60 = vmul.f32 %v341_v55, %v281_v57 }
 0x1be   :  { %v290_v61 = vmul.f32 %v279_v59, %v258_v38 }
 0x1bf   :  { %v283_v63 = vmul.f32 0.5, %v282_v60 }
 0x1c0   :  { %v295_v0 = vmul.f32 %v334_v58, %v290_v61 }
 0x1c1   :  { %v284_v1 = vsub.f32 1.5, %v283_v63 }
 0x1c2   :  { %v300_v2 = vadd.f32 %v335_v62, %v295_v0 }
 0x1c3   :  { %v285_v3 = vmul.f32 %v341_v55, %v284_v1 }
 0x1c4   :  { %302 = vst [vmem:[#allocation8] sm:$0xff] %v300_v2 }
 0x1c5   :  { %v289_v4 = vsel %vm288_vm6, %v341_v55, %v285_v3 }
 0x1c6   :  { %v291_v5 = vmul.f32 %v289_v4, %v259_v42 }
 0x1c8   :  { %v296_v6 = vmul.f32 %v334_v58, %v291_v5 }
 0x1ca   :  { %v301_v7 = vadd.f32 %v335_v62, %v296_v6 }
 0x1cc   :  { %303 = vst [vmem:[#allocation8 + $0x8] sm:$0xff] %v301_v7 }
 0x1cd   :  { %316 = dma.vmem_to_hbm [thread:$0]  %s309_s4, 256, %s311_s21, [#allocation4], %s445_s29, %s445_s29, %s446_s30  }
 0x1ce   :  { %442 = dma.done.wait [#allocation4], 256  }
 0x1cf   :  { %443 = vsyncadd [#allocation4], 4294967040 }
 0x1d0   :  { %321 = vsyncpa [#allocation3], 1 }
 0x1d1   :  { %322 = vsyncpa [#allocation6], 1 }
 0x1d2   :  { %323 = vsyncpa [#allocation4], 1 }

</bundles_post_ra>
